<compile_context>
chip_gen: v6e
topology: v6e:2x2x1
jax: 0.10.0
libtpu: 0.0.40
codegen_flags: <defaults>
</compile_context>

<pallas_src>
import functools

import jax
import jax.numpy as jnp
from jax import lax
from jax.experimental import pallas as pl
from jax.experimental.pallas import tpu as pltpu


def _round_up(a: int, b: int) -> int:
    return (a + b - 1) // b * b


def _translayer_kernel(x_ref, w_ref, o_ref, acc_ref):
    # x_ref:   (TM, TK) tile of the flattened input
    # w_ref:   (TN, TK) tile of the weight (native [N, K] layout, no transpose)
    # o_ref:   (TM, TN) output tile
    # acc_ref: (TM, TN) f32 accumulator, resident across the K grid axis
    @pl.when(pl.program_id(2) == 0)
    def _():
        acc_ref[...] = jnp.zeros_like(acc_ref)

    # Contract x's K axis against w's K axis on the MXU (A @ B^T form).
    acc_ref[...] += lax.dot_general(
        x_ref[...],
        w_ref[...],
        dimension_numbers=(((1,), (1,)), ((), ())),
        preferred_element_type=jnp.float32,
    )

    @pl.when(pl.program_id(2) == pl.num_programs(2) - 1)
    def _():
        o_ref[...] = acc_ref[...].astype(o_ref.dtype)


@functools.partial(jax.jit, static_argnames=("tile_m", "tile_n", "tile_k"))
def trans_layer_forward(x, weight, *, tile_m=256, tile_n=256, tile_k=512):
    """y = x @ weight.T  (PyTorch F.linear(x, weight), no bias)."""
    *lead, k = x.shape
    n, kw = weight.shape
    assert k == kw, f"feature dim mismatch: x[...,{k}] vs weight[{n},{kw}]"

    x2 = x.reshape(-1, k)
    m = x2.shape[0]

    # Clamp tiles for small problems (single block), keeping (8,128) alignment
    # and a lane-dense (multiple-of-128) output N tile.
    tm = min(tile_m, _round_up(m, 8))
    tn = min(tile_n, _round_up(n, 128))
    tk = min(tile_k, _round_up(k, 128))

    # Pad the problem to tile multiples; zero padding along K is exact,
    # padded M rows / N cols are sliced off below.
    m_pad = _round_up(m, tm)
    n_pad = _round_up(n, tn)
    k_pad = _round_up(k, tk)

    x_p = x2
    if (m_pad, k_pad) != (m, k):
        x_p = jnp.pad(x2, ((0, m_pad - m), (0, k_pad - k)))
    w_p = weight
    if (n_pad, k_pad) != (n, k):
        w_p = jnp.pad(weight, ((0, n_pad - n), (0, k_pad - k)))

    grid = (m_pad // tm, n_pad // tn, k_pad // tk)

    bytes_accessed = (
        m_pad * k_pad * x_p.dtype.itemsize
        + n_pad * k_pad * w_p.dtype.itemsize
        + m_pad * n_pad * x.dtype.itemsize
    )
    cost = pl.CostEstimate(
        flops=2 * m_pad * n_pad * k_pad,
        transcendentals=0,
        bytes_accessed=bytes_accessed,
    )

    out = pl.pallas_call(
        _translayer_kernel,
        out_shape=jax.ShapeDtypeStruct((m_pad, n_pad), x.dtype),
        grid_spec=pltpu.PrefetchScalarGridSpec(
            num_scalar_prefetch=0,
            grid=grid,
            in_specs=[
                pl.BlockSpec((tm, tk), lambda i, j, kk: (i, kk)),
                pl.BlockSpec((tn, tk), lambda i, j, kk: (j, kk)),
            ],
            out_specs=pl.BlockSpec((tm, tn), lambda i, j, kk: (i, j)),
            scratch_shapes=[pltpu.VMEM((tm, tn), jnp.float32)],
        ),
        compiler_params=pltpu.CompilerParams(
            dimension_semantics=("parallel", "parallel", "arbitrary"),
            vmem_limit_bytes=32 * 1024 * 1024,
        ),
        cost_estimate=cost,
    )(x_p, w_p)

    return out[:m, :n].reshape(*lead, n)


if __name__ == "__main__":
    # TransLayer(input_dim=16, output_dim=32):
    #   weight shape (16, 32); x last dim must be 32; y last dim is 16.
    input_dim, output_dim = 16, 32
    batch, seq = 2, 8

    key = jax.random.PRNGKey(0)
    kx, kw = jax.random.split(key)
    x = jax.random.normal(kx, (batch, seq, output_dim), dtype=jnp.float32)
    # Module init is torch.zeros; use a deterministic random weight so the
    # matmul is non-trivial to verify (forward semantics are init-agnostic).
    weight = jax.random.normal(kw, (input_dim, output_dim), dtype=jnp.float32)

    y = trans_layer_forward(x, weight)
    jax.block_until_ready(y)

    y_ref = jnp.einsum("bsk,nk->bsn", x, weight)
    assert y.shape == (batch, seq, input_dim)
    assert jnp.allclose(y, y_ref, atol=1e-5, rtol=1e-5)

    # Also exercise a larger, non-tile-divisible shape to validate padding,
    # the N/K grid axes and the K-resident accumulator path.
    kx2, kw2 = jax.random.split(kw)
    x_big = jax.random.normal(kx2, (3, 100, 384), dtype=jnp.float32)
    w_big = jax.random.normal(kw2, (200, 384), dtype=jnp.float32)
    y_big = trans_layer_forward(x_big, w_big)
    jax.block_until_ready(y_big)
    y_big_ref = jnp.einsum("bsk,nk->bsn", x_big, w_big)
    assert jnp.allclose(y_big, y_big_ref, atol=1e-4, rtol=1e-4)

    print("KERNEL_OK")
</pallas_src>

<mosaic_0001>
module attributes {stable_mosaic.version = 11 : i64} {
  func.func @_translayer_kernel(%arg0: i32, %arg1: i32, %arg2: i32, %arg3: memref<16x128xf32, #tpu.memory_space<vmem>>, %arg4: memref<128x128xf32, #tpu.memory_space<vmem>>, %arg5: memref<16x128xf32, #tpu.memory_space<vmem>>, %arg6: memref<16x128xf32, #tpu.memory_space<vmem>>) attributes {dimension_semantics = [#tpu.dimension_semantics<parallel>, #tpu.dimension_semantics<parallel>, #tpu.dimension_semantics<arbitrary>], iteration_bounds = array<i64: 1, 1, 1>, scalar_prefetch = 0 : i64, scratch_operands = 1 : i64, tpu.core_type = #tpu.core_type<tc>, window_params = [{transform_indices = @transform_0, window_bounds = array<i64: 16, 128>}, {transform_indices = @transform_1, window_bounds = array<i64: 128, 128>}, {transform_indices = @transform_2, window_bounds = array<i64: 16, 128>}]} {
    %c0_i32 = arith.constant 0 : i32
    %0 = arith.cmpi eq, %arg2, %c0_i32 : i32
    %1 = arith.extui %0 : i1 to i32
    %c0_i32_0 = arith.constant 0 : i32
    %2 = arith.cmpi ne, %1, %c0_i32_0 : i32
    scf.if %2 {
      %cst_10 = arith.constant 0.000000e+00 : f32
      %12 = vector.broadcast %cst_10 : f32 to vector<16x128xf32>
      %c0_11 = arith.constant 0 : index
      %c0_12 = arith.constant 0 : index
      %13 = vector.load %arg6[%c0_11, %c0_12] : memref<16x128xf32, #tpu.memory_space<vmem>>, vector<16x128xf32>
      tpu.vector_store %arg6[%c0_11, %c0_12], %12 {strides = array<i32>} : memref<16x128xf32, #tpu.memory_space<vmem>>, vector<16x128xf32>,
    } else {
    }
    %c0 = arith.constant 0 : index
    %c0_1 = arith.constant 0 : index
    %3 = vector.load %arg6[%c0, %c0_1] : memref<16x128xf32, #tpu.memory_space<vmem>>, vector<16x128xf32>
    %c0_2 = arith.constant 0 : index
    %c0_3 = arith.constant 0 : index
    %4 = vector.load %arg3[%c0_2, %c0_3] : memref<16x128xf32, #tpu.memory_space<vmem>>, vector<16x128xf32>
    %c0_4 = arith.constant 0 : index
    %c0_5 = arith.constant 0 : index
    %5 = vector.load %arg4[%c0_4, %c0_5] : memref<128x128xf32, #tpu.memory_space<vmem>>, vector<128x128xf32>
    %cst = arith.constant dense<0.000000e+00> : vector<16x128xf32>
    %6 = tpu.matmul %4, %5, %cst {dimension_numbers = #tpu.dot_dimension_numbers<[1], [1], [0], [0], [0, 0, 1, 0], [], []>} : vector<16x128xf32>, vector<128x128xf32>, vector<16x128xf32> -> vector<16x128xf32>
    %7 = arith.addf %3, %6 : vector<16x128xf32>
    %c0_6 = arith.constant 0 : index
    %c0_7 = arith.constant 0 : index
    %8 = vector.load %arg6[%c0_6, %c0_7] : memref<16x128xf32, #tpu.memory_space<vmem>>, vector<16x128xf32>
    tpu.vector_store %arg6[%c0_6, %c0_7], %7 {strides = array<i32>} : memref<16x128xf32, #tpu.memory_space<vmem>>, vector<16x128xf32>,
    %c0_i32_8 = arith.constant 0 : i32
    %9 = arith.cmpi eq, %arg2, %c0_i32_8 : i32
    %10 = arith.extui %9 : i1 to i32
    %c0_i32_9 = arith.constant 0 : i32
    %11 = arith.cmpi ne, %10, %c0_i32_9 : i32
    scf.if %11 {
      %c0_10 = arith.constant 0 : index
      %c0_11 = arith.constant 0 : index
      %12 = vector.load %arg6[%c0_10, %c0_11] : memref<16x128xf32, #tpu.memory_space<vmem>>, vector<16x128xf32>
      %c0_12 = arith.constant 0 : index
      %c0_13 = arith.constant 0 : index
      %13 = vector.load %arg5[%c0_12, %c0_13] : memref<16x128xf32, #tpu.memory_space<vmem>>, vector<16x128xf32>
      tpu.vector_store %arg5[%c0_12, %c0_13], %12 {strides = array<i32>} : memref<16x128xf32, #tpu.memory_space<vmem>>, vector<16x128xf32>,
    } else {
    }
    return
  }
  func.func @transform_0(%arg0: i32, %arg1: i32, %arg2: i32) -> (i32, i32) {
    %c0_i32 = arith.constant 0 : i32
    return %arg0, %arg2 : i32, i32
  }
  func.func @transform_1(%arg0: i32, %arg1: i32, %arg2: i32) -> (i32, i32) {
    %c0_i32 = arith.constant 0 : i32
    return %arg1, %arg2 : i32, i32
  }
  func.func @transform_2(%arg0: i32, %arg1: i32, %arg2: i32) -> (i32, i32) {
    %c0_i32 = arith.constant 0 : i32
    return %arg0, %arg1 : i32, i32
  }
}

</mosaic_0001>

<bundles_post_ra>
// kernel: trans_layer_forward.1
= control target key start
LH: loop header
LB: loop body
LE: loop exit
PB: predicated region body
PF: predicated region fallthrough
CT: control target
= control target key end

     0   :  { %s255_s1 = inlined_call_operand.vmem [shape: f32[128,128], index: 1, kind: input, shape index: {}]   ;;  %s256_s0 = inlined_call_operand.vmem [shape: f32[16,128], index: 0, kind: input, shape index: {}]   ;;  %s257_s2 = inlined_call_operand.vmem [shape: f32[16,128], index: 2, kind: output, shape index: {}]  }
   0x1   :  { %v36_v0 = vld [vmem:[%s255_s1 + $0x78] sm:$0xff]  ;;  %v35_v1 = vld [vmem:[%s255_s1 + $0x70] sm:$0xff]  ;;  %v34_v2 = vld [vmem:[%s255_s1 + $0x68] sm:$0xff] }
   0x2   :  { %145 = vmatprep.subr.mxu0 %v36_v0  ;;  %v19_v3 = vld [vmem:[%s256_s0] sm:$0xff]  ;;  %v32_v5 = vld [vmem:[%s255_s1 + $0x58] sm:$0xff]  ;;  %v31_v6 = vld [vmem:[%s255_s1 + $0x50] sm:$0xff] }
   0x3   :  { %146 = vmatpush3.xpose.msra.mxu0 %v36_v0  ;;  %177 = vmatprep.mubr.f32.mxu0 %v19_v3  ;;  %v33_v4 = vld [vmem:[%s255_s1 + $0x60] sm:$0xff]  ;;  %v30_v7 = vld [vmem:[%s255_s1 + $0x48] sm:$0xff]  ;;  %v28_v9 = vld [vmem:[%s255_s1 + $0x38] sm:$0xff] }
   0x4   :  { %147 = vmatprep.subr.mxu0 %v35_v1  ;;  %v29_v8 = vld [vmem:[%s255_s1 + $0x40] sm:$0xff]  ;;  %v27_v10 = vld [vmem:[%s255_s1 + $0x30] sm:$0xff]  ;;  %v26_v11 = vld [vmem:[%s255_s1 + $0x28] sm:$0xff] }
   0x5   :  { %v25_v12 = vld [vmem:[%s255_s1 + $0x20] sm:$0xff]  ;;  %v24_v13 = vld [vmem:[%s255_s1 + $0x18] sm:$0xff]  ;;  %v23_v14 = vld [vmem:[%s255_s1 + $0x10] sm:$0xff] }
   0x6   :  { %v22_v15 = vld [vmem:[%s255_s1 + $0x8] sm:$0xff]  ;;  %v21_v16 = vld [vmem:[%s255_s1] sm:$0xff] }
   0x7   :  { %148 = vmatpush3.xpose.msra.mxu0 %v35_v1  ;;  %v20_v17 = vld [vmem:[%s256_s0 + $0x8] sm:$0xff] }
   0x8   :  { %149 = vmatprep.subr.mxu0 %v34_v2 }
   0xb   :  { %150 = vmatpush3.xpose.msra.mxu0 %v34_v2 }
   0xc   :  { %151 = vmatprep.subr.mxu0 %v33_v4 }
   0xf   :  { %152 = vmatpush3.xpose.msra.mxu0 %v33_v4 }
  0x10   :  { %153 = vmatprep.subr.mxu0 %v32_v5 }
  0x13   :  { %154 = vmatpush3.xpose.msra.mxu0 %v32_v5 }
  0x14   :  { %155 = vmatprep.subr.mxu0 %v31_v6 }
  0x17   :  { %156 = vmatpush3.xpose.msra.mxu0 %v31_v6 }
  0x18   :  { %157 = vmatprep.subr.mxu0 %v30_v7 }
  0x1b   :  { %158 = vmatpush3.xpose.msra.mxu0 %v30_v7 }
  0x1c   :  { %159 = vmatprep.subr.mxu0 %v29_v8 }
  0x1f   :  { %160 = vmatpush3.xpose.msra.mxu0 %v29_v8 }
  0x20   :  { %161 = vmatprep.subr.mxu0 %v28_v9 }
  0x23   :  { %162 = vmatpush3.xpose.msra.mxu0 %v28_v9 }
  0x24   :  { %163 = vmatprep.subr.mxu0 %v27_v10 }
  0x27   :  { %164 = vmatpush3.xpose.msra.mxu0 %v27_v10 }
  0x28   :  { %165 = vmatprep.subr.mxu0 %v26_v11 }
  0x2b   :  { %166 = vmatpush3.xpose.msra.mxu0 %v26_v11 }
  0x2c   :  { %167 = vmatprep.subr.mxu0 %v25_v12 }
  0x2f   :  { %168 = vmatpush3.xpose.msra.mxu0 %v25_v12 }
  0x30   :  { %169 = vmatprep.subr.mxu0 %v24_v13 }
  0x33   :  { %170 = vmatpush3.xpose.msra.mxu0 %v24_v13 }
  0x34   :  { %171 = vmatprep.subr.mxu0 %v23_v14 }
  0x37   :  { %172 = vmatpush3.xpose.msra.mxu0 %v23_v14 }
  0x38   :  { %173 = vmatprep.subr.mxu0 %v22_v15 }
  0x3b   :  { %174 = vmatpush3.xpose.msra.mxu0 %v22_v15 }
  0x3c   :  { %175 = vmatprep.subr.mxu0 %v21_v16 }
  0x3f   :  { %176 = vmatpush3.xpose.msra.mxu0 %v21_v16 }
  0x42   :  { %178 = vmatmul.mubr.f32.vlgmr.msra.gmra.mxu0 %v20_v17 }
 0x102   :  { %v179_v18 = vpop.f32.mrf.mxu0 }
 0x103   :  { %122 = vst [vmem:[%s257_s2 + $0x8] sm:$0xff] %v179_v18 }
 0x104   :  { %v103_v19 = vpop.f32.mrf.mxu0 }
 0x105   :  { %121 = vst [vmem:[%s257_s2] sm:$0xff] %v103_v19 }

</bundles_post_ra>
